<compile_context>
chip_gen: v7x
topology: tpu7x:2x2x1
jax: 0.10.0
libtpu: 0.0.40
codegen_flags: <defaults>
</compile_context>

<pallas_src>
import jax
import jax.numpy as jnp
from jax.experimental import pallas as pl
from jax.experimental.pallas import tpu as pltpu


def _ripplenet_kernel(proj_ref, head_ref, tail_ref, item_ref, out_ref, o_acc):
    """Grid = (batch_tiles, H).  One hop of one batch tile per invocation.

    proj_ref / head_ref / tail_ref : (1, TB, M, D)  bf16 (or f32)
    item_ref                       : (TB, D)        f32
    out_ref                        : (TB, 1)        f32
    o_acc (scratch)                : (TB, D)        f32, accumulated over hops
    """
    h = pl.program_id(1)

    @pl.when(h == 0)
    def _():
        o_acc[...] = jnp.zeros_like(o_acc)

    proj = proj_ref[0].astype(jnp.float32)        # (TB, M, D) = item^T R
    head = head_ref[0].astype(jnp.float32)        # (TB, M, D)

    # hRv[b, m] = item[b]^T R[b,m] head[b,m] = sum_d proj[b,m,d] * head[b,m,d]
    hRv = jnp.sum(proj * head, axis=-1)           # (TB, M)

    # softmax over the memory axis (PyTorch softmax(dim=1))
    mx = jnp.max(hRv, axis=-1, keepdims=True)
    ex = jnp.exp(hRv - mx)
    pi = ex * pl.reciprocal(jnp.sum(ex, axis=-1, keepdims=True), approx=True)

    tails = tail_ref[0].astype(jnp.float32)       # (TB, M, D)
    # o_h[b, d] = sum_m pi[b, m] * tails[b, m, d]
    o_acc[...] += jnp.sum(pi[:, :, None] * tails, axis=1)     # (TB, D)

    @pl.when(h == pl.num_programs(1) - 1)
    def _():
        item = item_ref[...]                                   # (TB, D) f32
        score = jnp.sum(o_acc[...] * item, axis=-1, keepdims=True)
        out_ref[...] = jax.nn.sigmoid(score)


def ripplenet_forward(ent_emb, rel_emb, pairs, ripple_sets, *,
                      tile_b=None,
                      compute_dtype=jnp.bfloat16,
                      vmem_limit_bytes=64 * 1024 * 1024):
    """ent_emb: (n_entities, D) f32; rel_emb: (n_rel, D, D) f32;
    pairs: (B, 2) int32 [user, item]; ripple_sets: (n_users, H, 3, M) int32."""
    users = pairs[:, 0]
    items = pairs[:, 1]
    B = pairs.shape[0]
    H = ripple_sets.shape[1]
    M = ripple_sets.shape[3]
    D = ent_emb.shape[1]

    # --- Hop-major index tensors (transposing int32 indices is ~free; the
    # gathered float tensors then land hop-major directly). ----------------
    rs = ripple_sets[users]                                  # (B, H, 3, M)
    heads_hm = jnp.transpose(rs[:, :, 0, :], (1, 0, 2))      # (H, B, M)
    rels_hm = jnp.transpose(rs[:, :, 1, :], (1, 0, 2))       # (H, B, M)
    tails_hm = jnp.transpose(rs[:, :, 2, :], (1, 0, 2))      # (H, B, M)

    item_emb = ent_emb[items]                                # (B, D) f32

    # --- Pre-project the item through every relation matrix on the MXU:
    #   proj[b, r, :] = item[b]^T rel_emb[r]        (B, n_rel, D)
    # hRv = item^T R head = sum_d proj[rel] * head, so the (D, D) relation
    # matrices never enter the kernel at all. -------------------------------
    proj = jnp.einsum('bi,rij->brj', item_emb, rel_emb)      # (B, n_rel, D)

    # --- Gathers (glue).  bf16 storage halves the HBM bytes streamed. ------
    batch_ix = jnp.arange(B, dtype=jnp.int32)[None, :, None]            # (1,B,1)
    proj_g = proj[batch_ix, rels_hm, :].astype(compute_dtype)           # (H,B,M,D)
    head_g = ent_emb[heads_hm].astype(compute_dtype)                    # (H,B,M,D)
    tail_g = ent_emb[tails_hm].astype(compute_dtype)                    # (H,B,M,D)
    item_k = item_emb.astype(jnp.float32)                               # (B,D)

    # --- Batch tile sized from a VMEM budget (double-buffered bf16 streams);
    # fits v7x's 64 MiB VMEM with headroom, v5e/v6e trivially. --------------
    itemsize = jnp.dtype(compute_dtype).itemsize
    if tile_b is None:
        bytes_per_row = 3 * 2 * M * D * itemsize            # 3 streams, 2 buffers
        tile_b = max(8, min(512, (24 * 1024 * 1024) // max(bytes_per_row, 1)))
        tile_b = min(tile_b, B)
        if tile_b < B:
            tile_b = max(8, (tile_b // 8) * 8)               # sublane-aligned blocks
    nb = pl.cdiv(B, tile_b)

    cost = pl.CostEstimate(
        flops=int(H * B * (4 * M * D + 8 * M + 3 * D) + 3 * B * D),
        transcendentals=int(H * B * M + B),
        bytes_accessed=int(3 * H * B * M * D * itemsize + H * B * D * 4 + B * 4),
    )

    out = pl.pallas_call(
        _ripplenet_kernel,
        out_shape=jax.ShapeDtypeStruct((B, 1), jnp.float32),
        grid_spec=pltpu.PrefetchScalarGridSpec(
            num_scalar_prefetch=0,
            grid=(nb, H),
            in_specs=[
                pl.BlockSpec((1, tile_b, M, D), lambda b, h: (h, b, 0, 0)),
                pl.BlockSpec((1, tile_b, M, D), lambda b, h: (h, b, 0, 0)),
                pl.BlockSpec((1, tile_b, M, D), lambda b, h: (h, b, 0, 0)),
                pl.BlockSpec((tile_b, D), lambda b, h: (b, 0)),
            ],
            out_specs=pl.BlockSpec((tile_b, 1), lambda b, h: (b, 0)),
            scratch_shapes=[pltpu.VMEM((tile_b, D), jnp.float32)],
        ),
        compiler_params=pltpu.CompilerParams(
            dimension_semantics=("parallel", "arbitrary"),
            vmem_limit_bytes=vmem_limit_bytes),
        cost_estimate=cost,
    )(proj_g, head_g, tail_g, item_k)

    return out[:, 0]   # predicts, shape (B,)


def ripplenet_reference(ent_emb, rel_emb, pairs, ripple_sets):
    """Pure-JAX reference mirroring the PyTorch forward (f32 throughout)."""
    users = pairs[:, 0]
    items = pairs[:, 1]
    H = ripple_sets.shape[1]
    item_emb = ent_emb[items]                                  # (B, D)
    o = jnp.zeros_like(item_emb)
    for h in range(H):
        heads = ent_emb[ripple_sets[users, h, 0, :]]           # (B, M, D)
        rels = rel_emb[ripple_sets[users, h, 1, :]]            # (B, M, D, D)
        tails = ent_emb[ripple_sets[users, h, 2, :]]           # (B, M, D)
        Rh = jnp.einsum('bmij,bmj->bmi', rels, heads)
        hRv = jnp.einsum('bmi,bi->bm', Rh, item_emb)
        pi = jax.nn.softmax(hRv, axis=1)
        o = o + jnp.sum(pi[:, :, None] * tails, axis=1)
    return jax.nn.sigmoid(jnp.sum(o * item_emb, axis=1))


def xavier_uniform(key, shape):
    """Matches torch.nn.init.xavier_uniform_ fan computation."""
    if len(shape) == 2:
        fan_out, fan_in = shape[0], shape[1]
    else:
        receptive = 1
        for s in shape[2:]:
            receptive *= s
        fan_in = shape[1] * receptive
        fan_out = shape[0] * receptive
    bound = (6.0 / (fan_in + fan_out)) ** 0.5
    return jax.random.uniform(key, shape, jnp.float32, -bound, bound)


if __name__ == "__main__":
    # Small, deterministic configuration.
    dim = 32          # embedding dim D
    n_entities = 64
    n_rel = 8
    H = 2             # hops
    n_memory = 8      # ripple-set size per hop per user (M)
    n_users = 4
    batch = 2

    key = jax.random.PRNGKey(0)
    k_ent, k_rel, k_rip_h, k_rip_r, k_rip_t, k_pairs_u, k_pairs_i = \
        jax.random.split(key, 7)

    ent_emb = xavier_uniform(k_ent, (n_entities, dim))
    rel_emb = xavier_uniform(k_rel, (n_rel, dim, dim))

    # ripple_sets[user, hop, 0/1/2, m] = head / relation / tail indices
    rip_heads = jax.random.randint(k_rip_h, (n_users, H, 1, n_memory), 0, n_entities)
    rip_rels = jax.random.randint(k_rip_r, (n_users, H, 1, n_memory), 0, n_rel)
    rip_tails = jax.random.randint(k_rip_t, (n_users, H, 1, n_memory), 0, n_entities)
    ripple_sets = jnp.concatenate([rip_heads, rip_rels, rip_tails], axis=2).astype(jnp.int32)

    users = jax.random.randint(k_pairs_u, (batch, 1), 0, n_users)
    items = jax.random.randint(k_pairs_i, (batch, 1), 0, n_entities)
    pairs = jnp.concatenate([users, items], axis=1).astype(jnp.int32)

    predicts = jax.block_until_ready(
        ripplenet_forward(ent_emb, rel_emb, pairs, ripple_sets))
    ref = jax.block_until_ready(
        ripplenet_reference(ent_emb, rel_emb, pairs, ripple_sets))

    assert predicts.shape == (batch,)
    # bf16 input storage + approx reciprocal => relaxed tolerance vs f32 ref.
    assert jnp.allclose(predicts, ref, atol=1e-2, rtol=1e-2), (predicts, ref)

    print("KERNEL_OK")
</pallas_src>

<mosaic_0001>
module attributes {stable_mosaic.version = 11 : i64} {
  func.func @_ripplenet_kernel(%arg0: i32, %arg1: i32, %arg2: memref<1x2x8x32xbf16, #tpu.memory_space<vmem>>, %arg3: memref<1x2x8x32xbf16, #tpu.memory_space<vmem>>, %arg4: memref<1x2x8x32xbf16, #tpu.memory_space<vmem>>, %arg5: memref<2x32xf32, #tpu.memory_space<vmem>>, %arg6: memref<2x1xf32, #tpu.memory_space<vmem>>, %arg7: memref<2x32xf32, #tpu.memory_space<vmem>>) attributes {dimension_semantics = [#tpu.dimension_semantics<parallel>, #tpu.dimension_semantics<arbitrary>], iteration_bounds = array<i64: 1, 2>, scalar_prefetch = 0 : i64, scratch_operands = 1 : i64, tpu.core_type = #tpu.core_type<tc>, window_params = [{transform_indices = @transform_0, window_bounds = array<i64: 1, 2, 8, 32>}, {transform_indices = @transform_1, window_bounds = array<i64: 1, 2, 8, 32>}, {transform_indices = @transform_2, window_bounds = array<i64: 1, 2, 8, 32>}, {transform_indices = @transform_3, window_bounds = array<i64: 2, 32>}, {transform_indices = @transform_4, window_bounds = array<i64: 2, 1>}]} {
    %c0_i32 = arith.constant 0 : i32
    %0 = arith.cmpi eq, %arg1, %c0_i32 : i32
    %1 = arith.extui %0 : i1 to i32
    %c0_i32_0 = arith.constant 0 : i32
    %2 = arith.cmpi ne, %1, %c0_i32_0 : i32
    scf.if %2 {
      %cst_20 = arith.constant 0.000000e+00 : f32
      %34 = vector.broadcast %cst_20 : f32 to vector<2x32xf32>
      %c0_21 = arith.constant 0 : index
      %c0_22 = arith.constant 0 : index
      %35 = vector.load %arg7[%c0_21, %c0_22] : memref<2x32xf32, #tpu.memory_space<vmem>>, vector<2x32xf32>
      tpu.vector_store %arg7[%c0_21, %c0_22], %34 {strides = array<i32>} : memref<2x32xf32, #tpu.memory_space<vmem>>, vector<2x32xf32>,
    } else {
    }
    %c0 = arith.constant 0 : index
    %c0_1 = arith.constant 0 : index
    %c0_2 = arith.constant 0 : index
    %c0_3 = arith.constant 0 : index
    %3 = vector.load %arg2[%c0, %c0_1, %c0_2, %c0_3] : memref<1x2x8x32xbf16, #tpu.memory_space<vmem>>, vector<1x2x8x32xbf16>
    %4 = vector.shape_cast %3 : vector<1x2x8x32xbf16> to vector<2x8x32xbf16>
    %5 = arith.extf %4 : vector<2x8x32xbf16> to vector<2x8x32xf32>
    %c0_4 = arith.constant 0 : index
    %c0_5 = arith.constant 0 : index
    %c0_6 = arith.constant 0 : index
    %c0_7 = arith.constant 0 : index
    %6 = vector.load %arg3[%c0_4, %c0_5, %c0_6, %c0_7] : memref<1x2x8x32xbf16, #tpu.memory_space<vmem>>, vector<1x2x8x32xbf16>
    %7 = vector.shape_cast %6 : vector<1x2x8x32xbf16> to vector<2x8x32xbf16>
    %8 = arith.extf %7 : vector<2x8x32xbf16> to vector<2x8x32xf32>
    %9 = arith.mulf %5, %8 : vector<2x8x32xf32>
    %cst = arith.constant dense<0.000000e+00> : vector<2x8xf32>
    %10 = vector.multi_reduction <add>, %9, %cst [2] : vector<2x8x32xf32> to vector<2x8xf32>
    %cst_8 = arith.constant dense<0xFF800000> : vector<2xf32>
    %11 = vector.multi_reduction <maximumf>, %10, %cst_8 [1] : vector<2x8xf32> to vector<2xf32>
    %12 = vector.shape_cast %11 : vector<2xf32> to vector<2x1xf32>
    %13 = vector.broadcast %12 : vector<2x1xf32> to vector<2x8xf32>
    %14 = arith.subf %10, %13 : vector<2x8xf32>
    %15 = math.exp %14 : vector<2x8xf32>
    %cst_9 = arith.constant dense<0.000000e+00> : vector<2xf32>
    %16 = vector.multi_reduction <add>, %15, %cst_9 [1] : vector<2x8xf32> to vector<2xf32>
    %17 = vector.shape_cast %16 : vector<2xf32> to vector<2x1xf32>
    %18 = tpu.reciprocal %17 {approx = true} : vector<2x1xf32> -> vector<2x1xf32>
    %19 = vector.broadcast %18 : vector<2x1xf32> to vector<2x8xf32>
    %20 = arith.mulf %15, %19 : vector<2x8xf32>
    %c0_10 = arith.constant 0 : index
    %c0_11 = arith.constant 0 : index
    %c0_12 = arith.constant 0 : index
    %c0_13 = arith.constant 0 : index
    %21 = vector.load %arg4[%c0_10, %c0_11, %c0_12, %c0_13] : memref<1x2x8x32xbf16, #tpu.memory_space<vmem>>, vector<1x2x8x32xbf16>
    %22 = vector.shape_cast %21 : vector<1x2x8x32xbf16> to vector<2x8x32xbf16>
    %23 = arith.extf %22 : vector<2x8x32xbf16> to vector<2x8x32xf32>
    %c0_14 = arith.constant 0 : index
    %c0_15 = arith.constant 0 : index
    %24 = vector.load %arg7[%c0_14, %c0_15] : memref<2x32xf32, #tpu.memory_space<vmem>>, vector<2x32xf32>
    %25 = vector.shape_cast %20 : vector<2x8xf32> to vector<2x8x1xf32>
    %26 = vector.broadcast %25 : vector<2x8x1xf32> to vector<2x8x32xf32>
    %27 = arith.mulf %26, %23 : vector<2x8x32xf32>
    %cst_16 = arith.constant dense<0.000000e+00> : vector<2x32xf32>
    %28 = vector.multi_reduction <add>, %27, %cst_16 [1] : vector<2x8x32xf32> to vector<2x32xf32>
    %29 = arith.addf %24, %28 : vector<2x32xf32>
    %c0_17 = arith.constant 0 : index
    %c0_18 = arith.constant 0 : index
    %30 = vector.load %arg7[%c0_17, %c0_18] : memref<2x32xf32, #tpu.memory_space<vmem>>, vector<2x32xf32>
    tpu.vector_store %arg7[%c0_17, %c0_18], %29 {strides = array<i32>} : memref<2x32xf32, #tpu.memory_space<vmem>>, vector<2x32xf32>,
    %c1_i32 = arith.constant 1 : i32
    %31 = arith.cmpi eq, %arg1, %c1_i32 : i32
    %32 = arith.extui %31 : i1 to i32
    %c0_i32_19 = arith.constant 0 : i32
    %33 = arith.cmpi ne, %32, %c0_i32_19 : i32
    scf.if %33 {
      %c0_20 = arith.constant 0 : index
      %c0_21 = arith.constant 0 : index
      %34 = vector.load %arg5[%c0_20, %c0_21] : memref<2x32xf32, #tpu.memory_space<vmem>>, vector<2x32xf32>
      %c0_22 = arith.constant 0 : index
      %c0_23 = arith.constant 0 : index
      %35 = vector.load %arg7[%c0_22, %c0_23] : memref<2x32xf32, #tpu.memory_space<vmem>>, vector<2x32xf32>
      %36 = arith.mulf %35, %34 : vector<2x32xf32>
      %cst_24 = arith.constant dense<0.000000e+00> : vector<2xf32>
      %37 = vector.multi_reduction <add>, %36, %cst_24 [1] : vector<2x32xf32> to vector<2xf32>
      %38 = vector.shape_cast %37 : vector<2xf32> to vector<2x1xf32>
      %39 = arith.negf %38 : vector<2x1xf32>
      %40 = math.exp %39 : vector<2x1xf32>
      %cst_25 = arith.constant 1.000000e+00 : f32
      %41 = vector.broadcast %cst_25 : f32 to vector<2x1xf32>
      %42 = arith.addf %41, %40 : vector<2x1xf32>
      %43 = arith.divf %41, %42 : vector<2x1xf32>
      %c0_26 = arith.constant 0 : index
      %c0_27 = arith.constant 0 : index
      %44 = vector.load %arg6[%c0_26, %c0_27] : memref<2x1xf32, #tpu.memory_space<vmem>>, vector<2x1xf32>
      tpu.vector_store %arg6[%c0_26, %c0_27], %43 {strides = array<i32>} : memref<2x1xf32, #tpu.memory_space<vmem>>, vector<2x1xf32>,
    } else {
    }
    return
  }
  func.func @transform_0(%arg0: i32, %arg1: i32) -> (i32, i32, i32, i32) {
    %c0_i32 = arith.constant 0 : i32
    %c0_i32_0 = arith.constant 0 : i32
    %c0_i32_1 = arith.constant 0 : i32
    return %arg1, %arg0, %c0_i32, %c0_i32_0 : i32, i32, i32, i32
  }
  func.func @transform_1(%arg0: i32, %arg1: i32) -> (i32, i32, i32, i32) {
    %c0_i32 = arith.constant 0 : i32
    %c0_i32_0 = arith.constant 0 : i32
    %c0_i32_1 = arith.constant 0 : i32
    return %arg1, %arg0, %c0_i32, %c0_i32_0 : i32, i32, i32, i32
  }
  func.func @transform_2(%arg0: i32, %arg1: i32) -> (i32, i32, i32, i32) {
    %c0_i32 = arith.constant 0 : i32
    %c0_i32_0 = arith.constant 0 : i32
    %c0_i32_1 = arith.constant 0 : i32
    return %arg1, %arg0, %c0_i32, %c0_i32_0 : i32, i32, i32, i32
  }
  func.func @transform_3(%arg0: i32, %arg1: i32) -> (i32, i32) {
    %c0_i32 = arith.constant 0 : i32
    %c0_i32_0 = arith.constant 0 : i32
    return %arg0, %c0_i32 : i32, i32
  }
  func.func @transform_4(%arg0: i32, %arg1: i32) -> (i32, i32) {
    %c0_i32 = arith.constant 0 : i32
    %c0_i32_0 = arith.constant 0 : i32
    return %arg0, %c0_i32 : i32, i32
  }
}

</mosaic_0001>

<bundles_post_ra>
// kernel: tpu_custom_call.1
= control target key start
LH: loop header
LB: loop body
LE: loop exit
PB: predicated region body
PF: predicated region fallthrough
CT: control target
= control target key end

     0   :  { %s1285_s0 = inlined_call_operand.hbm [shape: bf16[2,2,8,32], index: 0, kind: input, shape index: {}]   ;;  %s1286_s1 = inlined_call_operand.hbm [shape: bf16[2,2,8,32], index: 1, kind: input, shape index: {}]   ;;  %s1287_s2 = inlined_call_operand.hbm [shape: bf16[2,2,8,32], index: 2, kind: input, shape index: {}]   ;;  %s1288_s3 = inlined_call_operand.hbm [shape: f32[2,32], index: 3, kind: input, shape index: {}]   ;;  %s1289_s4 = inlined_call_operand.hbm [shape: f32[2,1], index: 4, kind: output, shape index: {}]  }
   0x1   :  { %1304 = sst [smem:[#allocation18_spill]] %s1286_s1 }
   0x2   :  { %9 = vsyncpa [#allocation4], 0 }
   0x3   :  { %11 = vsyncpa [#allocation4 + $0x1], 0 }
   0x4   :  { %12 = vsyncpa [#allocation7], 0 }
   0x5   :  { %14 = vsyncpa [#allocation7 + $0x1], 0 }
   0x6   :  { %15 = vsyncpa [#allocation10], 0 }
   0x7   :  { %16 = vsyncpa [#allocation5], 0  ;;  %s998_s15 = smov 0   ;;  %s1000_s16 = smov 0  }
   0x8   :  { %s1002_s17 = smov 0   ;;  %s1004_s18 = smov 0  }
   0x9   :  { %s1006_s19 = smov 0   ;;  %s1008_s20 = smov 0  }
   0xa LB: > { %1305 = sst [smem:[#allocation16_spill]] %s958_s19  ;;  %s31_s21 = sadd.s32 1, %s958_s19  ;;  %s962_s20 = sphi %s1008_s20, %s22_s20   ;;  %s958_s19 = sphi %s1006_s19, %s1323_s19   ;;  %s954_s18 = sphi %s1004_s18, %s1322_s18   ;;  %s950_s17 = sphi %s1002_s17, %s1326_s17   ;;  %s946_s16 = sphi %s1000_s16, %s1325_s16   ;;  %s942_s15 = sphi %s998_s15, %s1324_s15  }
   0xb   : > { %s43_s22 = sadd.s32 1, %s950_s17  ;;  %p32_p0 = scmp.ge.s32.totalorder %s31_s21, 2 }
   0xc   : > { %p50_p1 = scmp.ne.s32.totalorder %s950_s17, %s946_s16  ;;  %p51_p2 = scmp.eq.s32.totalorder %s962_s20, 0 }
   0xd   : > { %s1328_s21 = smov (%p32_p0, %s31_s21), 0  ;;  %p686_p4 = scmp.lt.s32.totalorder %s962_s20, 2 }
   0xe   : > { %1306 = sst [smem:[#allocation17_spill]] %s1328_s21  ;;  %p52_p3 = por %p51_p2, %p50_p1 }
   0xf   : > { %s38_s23 = ssub.s32 %s958_s19, %s1328_s21  ;;  %s1294_s24 = sand.u32 1, %s950_s17  }
  0x10   : > { %p41_p5 = scmp.eq.s32.totalorder %s38_s23, 0  ;;  %s1041_s25 = sshll.u32 %s1294_s24, 3 }
  0x11   : > { %s1044_s26 = sshll.u32 %s958_s19, 7  ;;  %p1046_p6 = pnand %p686_p4, %p52_p3 }
  0x12   : > { %s1051_s28 = scalar_select %p41_p5, %s950_s17, %s43_s22  }
  0x13   : > { %s1307_s27 = scalar_select %p1046_p6, 1, 0 }
  0x14   : > { %s224_s29 = sand.u32 1, %s962_s20   ;;  %s1308_s1 = sld [smem:[#allocation18_spill]] }
  0x15   : > { %s228_s7 = scalar_lea.vmem [#allocation6], %s1041_s25  ;;  %s1063_s9 = scalar_lea.sflag [#allocation7], %s224_s29 }
  0x16   : > { %s237_s8 = sshll.u32 %s228_s7, 4  ;;  %p1069_p8 = pneg %p1046_p6  ;;  %s1061_s8 = int_to_ptr.vmem [resolvable:$true] %s237_s8 }
  0x18   : > { %s1309_s11 = scalar_select %p1069_p8, 1, 0 }
  0x1a   : > { %s1058_s6 = scalar_lea.hbm %s1308_s1, %s1044_s26  ;;  %s761_s14 = scalar_lea.hbm %s1308_s1, 256 }
  0x1b   : > { %s756_s10 = scalar_lea.hbm %s1058_s6, 128  ;;  %p762_p11 = scmp.lt.u32.totalorder %s1058_s6, %s1308_s1 }
  0x1c   : > { %p757_p7 = scmp.ne.s32.totalorder %s1058_s6, %s756_s10  ;;  %p763_p12 = scmp.lt.u32.totalorder %s761_s14, %s756_s10 }
  0x1d   : > { %p765_p0 = scmp.lt.u32.totalorder %s756_s10, %s1058_s6 }
  0x1e   : > { %p759_p9 = pnand %p1069_p8, %p757_p7  ;;  %p764_p13 = por %p763_p12, %p762_p11 }
  0x20   : > { %p760_p10 = pneg %p759_p9  ;;  %p766_p1 = por %p765_p0, %p764_p13 }
  0x22   : > { %p767_p2 = pnand %p766_p1, %p760_p10 }
  0x24   : > { %770 = shalt.err (!%p767_p2)
}
  0x25   : > { %s771_s29 = scalar_lea.vmem %s1061_s8, 128  ;;  %s964_s30 = smov [#allocation6]  }
  0x26   : > { %p772_p3 = scmp.ne.s32.totalorder %s1061_s8, %s771_s29  ;;  %s776_s5 = sshll.u32 %s964_s30, 4  ;;  %s777_s5 = int_to_ptr.vmem [resolvable:$false] %s776_s5 }
  0x27   : > { %s778_s7 = scalar_lea.vmem %s777_s5, 256  ;;  %p779_p7 = scmp.lt.s32.totalorder %s1061_s8, %s777_s5 }
  0x28   : > { %p774_p4 = pnand %p772_p3, %p1069_p8  ;;  %p780_p9 = scmp.lt.s32.totalorder %s778_s7, %s771_s29 }
  0x2a   : > { %p775_p5 = pneg %p774_p4  ;;  %p781_p11 = por %p780_p9, %p779_p7 }
  0x2c   : > { %p782_p12 = pnand %p781_p11, %p775_p5 }
  0x2e   : > { %785 = shalt.err (!%p782_p12)
}
  0x2f   : > { %s1290_s10 = smov 64   ;;  %s1292_s12 = smov 4  }
  0x30   : > { %681 = dma.hbm_to_vmem [thread:$0]  (!%p1046_p6), %s1058_s6, 128, %s1061_s8, %s1063_s9, %s1290_s10, %s1290_s10, %s1292_s12  }
  0x31   : > { %s1097_s13 = sadd.s32 4294967295, %s962_s20   ;;  %p56_p10 = scmp.ne.s32.totalorder %s946_s16, %s942_s15 }
  0x32   : > { %p1297_p13 = scmp.eq.s32.totalorder %s1097_s13, 0  ;;  %p618_p0 = scmp.ge.s32.totalorder %s962_s20, 1 }
  0x33   : > { %p175_p1 = scmp.lt.s32.totalorder %s962_s20, 3  ;;  %s967_s6 = smov [#allocation9]  }
  0x34   : > { %p1106_p2 = por %p1297_p13, %p56_p10  ;;  %s190_s8 = sshll.u32 %s967_s6, 4  ;;  %s191_s8 = int_to_ptr.vmem [resolvable:$true] %s190_s8 }
  0x35   : > { %p1110_p3 = pnand %p618_p0, %p175_p1  ;;  %s1120_s29 = scalar_lea.hbm %s1285_s0, %s1044_s26 }
  0x36   : > { %s1310_s14 = scalar_select %p1106_p2, 1, 0 }
  0x37   : > { %s1311_s22 = scalar_select %p1110_p3, 1, 0 }
  0x38   : > { %p671_p4 = pneg %p1110_p3  ;;  %s205_s5 = scalar_lea.vmem [#allocation3], %s1041_s25 }
  0x39   : > { %s214_s7 = sshll.u32 %s205_s5, 4  ;;  %s1135_s12 = scalar_lea.hbm %s1287_s2, %s1044_s26  ;;  %s1129_s7 = int_to_ptr.vmem [resolvable:$true] %s214_s7 }
  0x3a   : > { %p1124_p5 = pnand %p671_p4, %p1297_p13  ;;  %s786_s23 = scalar_lea.hbm %s1288_s3, 32 }
  0x3b   : > { %p787_p7 = scmp.ne.s32.totalorder %s1288_s3, %s786_s23  ;;  %p793_p10 = scmp.lt.u32.totalorder %s786_s23, %s1288_s3 }
  0x3c   : > { %p788_p9 = pneg %p1124_p5 }
  0x3e   : > { %p789_p11 = pnand %p788_p9, %p787_p7 }
  0x40   : > { %p790_p12 = pneg %p789_p11 }
  0x42   : > { %p795_p0 = pnand %p793_p10, %p790_p12 }
  0x44   : > { %798 = shalt.err (!%p795_p0)
}
  0x45   : > { %s799_s26 = scalar_lea.vmem %s191_s8, 32  ;;  %p807_p2 = scmp.lt.s32.totalorder %s191_s8, %s191_s8 }
  0x46   : > { %p800_p1 = scmp.ne.s32.totalorder %s191_s8, %s799_s26  ;;  %p808_p3 = scmp.lt.s32.totalorder %s799_s26, %s799_s26 }
  0x48   : > { %p802_p4 = pnand %p800_p1, %p788_p9  ;;  %p809_p6 = por %p808_p3, %p807_p2 }
  0x4a   : > { %p803_p13 = pneg %p802_p4 }
  0x4c   : > { %p810_p8 = pnand %p809_p6, %p803_p13 }
  0x4e   : > { %813 = shalt.err (!%p810_p8)
}
  0x4f   : > { %674 = dma.hbm_to_vmem [thread:$0]  (!%p1124_p5), %s1288_s3, 32, %s191_s8, [#allocation10]  }
  0x50   : > { %s1313_s19 = sand.u32 1, %s950_s17   ;;  %s814_s10 = scalar_lea.hbm %s1120_s29, 128 }
  0x51   : > { %s1155_s24 = scalar_lea.sflag [#allocation4], %s1313_s19  ;;  %p815_p7 = scmp.ne.s32.totalorder %s1120_s29, %s814_s10 }
  0x52   : > { %p1314_p2 = scmp.ne.s32.totalorder %s1309_s11, 0  ;;  %s819_s23 = scalar_lea.hbm %s1285_s0, 256 }
  0x53   : > { %p820_p13 = scmp.lt.u32.totalorder %s1120_s29, %s1285_s0  ;;  %p821_p3 = scmp.lt.u32.totalorder %s819_s23, %s814_s10 }
  0x54   : > { %p817_p6 = pnand %p815_p7, %p1314_p2  ;;  %p823_p11 = scmp.lt.u32.totalorder %s814_s10, %s1120_s29 }
  0x55   : > { %p822_p9 = por %p821_p3, %p820_p13 }
  0x56   : > { %p818_p8 = pneg %p817_p6 }
  0x57   : > { %p824_p5 = por %p823_p11, %p822_p9 }
  0x59   : > { %p825_p12 = pnand %p824_p5, %p818_p8 }
  0x5b   : > { %828 = shalt.err (!%p825_p12)
}
  0x5c   : > { %s829_s8 = scalar_lea.vmem %s1129_s7, 128  ;;  %s968_s26 = smov [#allocation3]  }
  0x5d   : > { %p830_p10 = scmp.ne.s32.totalorder %s1129_s7, %s829_s8  ;;  %s834_s1 = sshll.u32 %s968_s26, 4  ;;  %s835_s1 = int_to_ptr.vmem [resolvable:$false] %s834_s1 }
  0x5e   : > { %s836_s21 = scalar_lea.vmem %s835_s1, 256  ;;  %p837_p4 = scmp.lt.s32.totalorder %s1129_s7, %s835_s1 }
  0x5f   : > { %p832_p0 = pnand %p830_p10, %p1314_p2  ;;  %p838_p7 = scmp.lt.s32.totalorder %s836_s21, %s829_s8 }
  0x61   : > { %p833_p1 = pneg %p832_p0  ;;  %p839_p6 = por %p838_p7, %p837_p4 }
  0x63   : > { %p840_p13 = pnand %p839_p6, %p833_p1 }
  0x65   : > { %843 = shalt.err (!%p840_p13)
}
  0x66   : > { %p1315_p8 = scmp.ne.s32.totalorder %s1307_s27, 0  ;;  %s1316_s19 = smov 4  }
  0x67   : > { %s1317_s10 = smov 64   ;;  %s251_s6 = scalar_lea.vmem [#allocation8], %s1041_s25 }
  0x68   : > { %678 = dma.hbm_to_vmem [thread:$0]  (!%p1315_p8), %s1120_s29, 128, %s1129_s7, %s1155_s24, %s1317_s10, %s1317_s10, %s1316_s19  }
  0x69   : > { %s260_s30 = sshll.u32 %s251_s6, 4  ;;  %s844_s23 = scalar_lea.hbm %s1135_s12, 128  ;;  %s1183_s30 = int_to_ptr.vmem [resolvable:$true] %s260_s30 }
  0x6a   : > { %p845_p3 = scmp.ne.s32.totalorder %s1135_s12, %s844_s23  ;;  %s849_s8 = scalar_lea.hbm %s1287_s2, 256 }
  0x6b   : > { %p850_p5 = scmp.lt.u32.totalorder %s1135_s12, %s1287_s2  ;;  %p851_p12 = scmp.lt.u32.totalorder %s849_s8, %s844_s23 }
  0x6c   : > { %p847_p9 = pnand %p845_p3, %p1314_p2  ;;  %p853_p0 = scmp.lt.u32.totalorder %s844_s23, %s1135_s12 }
  0x6d   : > { %p852_p10 = por %p851_p12, %p850_p5 }
  0x6e   : > { %p848_p11 = pneg %p847_p9 }
  0x6f   : > { %p854_p1 = por %p853_p0, %p852_p10 }
  0x71   : > { %p855_p4 = pnand %p854_p1, %p848_p11 }
  0x73   : > { %858 = shalt.err (!%p855_p4)
}
  0x74   : > { %s859_s25 = scalar_lea.vmem %s1183_s30, 128  ;;  %s969_s29 = smov [#allocation8]  }
  0x75   : > { %p860_p7 = scmp.ne.s32.totalorder %s1183_s30, %s859_s25  ;;  %s864_s7 = sshll.u32 %s969_s29, 4  ;;  %s865_s7 = int_to_ptr.vmem [resolvable:$false] %s864_s7 }
  0x76   : > { %s866_s24 = scalar_lea.vmem %s865_s7, 256  ;;  %p867_p3 = scmp.lt.s32.totalorder %s1183_s30, %s865_s7 }
  0x77   : > { %p862_p6 = pnand %p860_p7, %p1314_p2  ;;  %p868_p9 = scmp.lt.s32.totalorder %s866_s24, %s859_s25 }
  0x79   : > { %p863_p13 = pneg %p862_p6  ;;  %p869_p5 = por %p868_p9, %p867_p3 }
  0x7b   : > { %p870_p12 = pnand %p869_p5, %p863_p13 }
  0x7d   : > { %873 = shalt.err (!%p870_p12)
}
  0x7e   : > { %684 = dma.hbm_to_vmem [thread:$0]  (!%p1315_p8), %s1135_s12, 128, %s1183_s30, %s1063_s9, %s1317_s10, %s1317_s10, %s1316_s19  }
  0x7f   : > { %p1318_p2 = scmp.ne.s32.totalorder %s1311_s22, 0 }
  0x80   : > { %s274_s11 = sand.u32 (!%p1318_p2), 1, %s946_s16   ;;  %p1319_p11 = scmp.ne.s32.totalorder (!%p1318_p2), %s1310_s14, 0 }
  0x81   : > { %272 = sbr.rel (%p1318_p2) target bundleno = 1112 (0x458), region = 36  ;;  %s1213_s21 = sshll.u32 (!%p1318_p2), %s274_s11, 3 }
  0x82   : > { %s275_s6 = scalar_lea.sflag (!%p1318_p2), [#allocation4], %s274_s11  ;;  %s278_s23 = scalar_lea.vmem (!%p1318_p2), [#allocation3], %s1213_s21 }
  0x88   : > { %925 = dma.done.wait (%p1319_p11), %s275_s6, 128  }
  0x89   : > { %927 = vsyncadd (%p1319_p11), %s275_s6, 4294967168  ;;  %s283_s27 = sand.u32 1, %s1097_s13   ;;  %s287_s12 = scalar_lea.vmem [#allocation6], %s1213_s21 }
  0x8a   : > { %s284_s9 = scalar_lea.sflag [#allocation7], %s283_s27 }
  0x8b   : > { %929 = dma.done.wait (%p1319_p11), %s284_s9, 256  }
  0x8c   : > { %931 = vsyncadd (%p1319_p11), %s284_s9, 4294967040  ;;  %s296_s22 = scalar_lea.vmem [#allocation8], %s1213_s21  ;;  %p1320_p8 = scmp.eq.s32.totalorder %s1097_s13, 0 }
  0x8e   : > { %933 = dma.done.wait (%p1320_p8), [#allocation10], 32   ;;  %p1321_p10 = pmov %p1320_p8 }
  0x8f   : > { %p635_p0 = scmp.ne.s32.totalorder %s954_s18, 0 }
  0x90   : > { %935 = vsyncadd (%p1321_p10), [#allocation10], 4294967264  ;;  %vm337_vm0 = vcmask (!%p635_p0), 254976   ;;  %v970_v0 = vmov (!%p635_p0), 0.0  }
  0x91   : > { %336 = sbr.rel (%p635_p0) target bundleno = 152 (0x98), region = 56  ;;  %338 = vst.msk [vmem:[#allocation2] sm:$0x3] (!%p635_p0), %vm337_vm0, %v970_v0 }
  0x98 PF: > { %v646_v1 = vld [vmem:[%s278_s23] sm:$0xff]   ;;  %v650_v2 = vld [vmem:[%s287_s12] sm:$0xff]   ;;  %vm349_vm1 = vcmask 261120   ;;  %v358_v11 = vlaneseq  ;;  %vm368_vm2 = vcmask 1041409   ;;  %vm371_vm3 = vcmask 58368   ;;  %p636_p1 = scmp.ne.s32.totalorder %s954_s18, 1 }
  0x99   : > { %v647_v3 = vunpack.c.l.bf16 %v646_v1  ;;  %v651_v4 = vunpack.c.l.bf16 %v650_v2  ;;  %v648_v5 = vunpack.c.h.bf16 %v646_v1  ;;  %v652_v6 = vunpack.c.h.bf16 %v650_v2  ;;  %v654_v45 = vld [vmem:[%s296_s22] sm:$0xff]   ;;  %v431_v1 = vld [vmem:[#allocation2] sm:$0x3] }
  0x9a   : > { %v359_v12 = vand.u32 127, %v358_v11  ;;  %v361_v13 = vshrl.u32 %v358_v11, 7  ;;  %v971_v21 = vmov 0   ;;  %v655_v46 = vunpack.c.l.bf16 %v654_v45 }
  0x9b   : > { %v347_v7 = vmul.f32 %v651_v4, %v647_v3  ;;  %v348_v8 = vmul.f32 %v652_v6, %v648_v5  ;;  %745 = vset.pattern.permute.xlu0 %v971_v21  ;;  %744 = vset.pattern.permute.xlu1 %v971_v21  ;;  %v656_v49 = vunpack.c.h.bf16 %v654_v45  ;;  %vm463_vm4 = vcmask 254976   ;;  %v469_v5 = vld [vmem:[#allocation9] sm:$0x3] (!%p636_p1) }
  0x9c   : > { %v362_v15 = vsub.s32 %v359_v12, %v361_v13  ;;  %v378_v22 = vsub.s32 0, %v361_v13  ;;  %v382_v23 = vsub.s32 1, %v361_v13  ;;  %vm481_vm5 = vcmask (!%p636_p1), 1024  }
  0x9d   : > { %v350_v9 = vsel %vm349_vm1, %v347_v7, 0.0  ;;  %v353_v10 = vsel %vm349_vm1, %v348_v8, 0.0 }
  0x9e   : > { %351 = vadd.xlane.f32.xlu0 %v350_v9 }
  0xa2   : > { %354 = vadd.xlane.f32.xlu0 %v353_v10 }
 0x12b   : > { %v352_v14 = vpop.xlane.xlu0 %351 }
 0x12c   : > { %v363_v17 = vrot.slane %v352_v14, %v362_v15 }
 0x12f   : > { %v355_v16 = vpop.xlane.xlu0 %354 }
 0x130   : > { %v367_v18 = vrot.slane %v355_v16, %v362_v15 }
 0x132   : > { %v369_v19 = vsel %vm368_vm2, %v367_v18, %v363_v17 }
 0x133   : > { %v372_v20 = vsel %vm371_vm3, %v369_v19, -inf }
 0x134   : > { %373 = vmax.xlane.f32.xlu1 %v372_v20 }
 0x1c1   : > { %v374_v24 = vpop.xlane.xlu1 %373 }
 0x1c2   : > { %v379_v25 = vrot.slane %v374_v24, %v378_v22  ;;  %v383_v26 = vrot.slane %v374_v24, %v382_v23 }
 0x1c4   : > { %v386_v27 = vsub.f32 %v352_v14, %v379_v25  ;;  %v387_v28 = vsub.f32 %v355_v16, %v383_v26 }
 0x1c6   : > { %v388_v29 = vmul.f32 1.442695, %v386_v27  ;;  %v390_v30 = vmul.f32 1.442695, %v387_v28 }
 0x1c8   : > { %746 = vpow2.f32 %v388_v29 }
 0x1c9   : > { %748 = vpow2.f32 %v390_v30 }
 0x1d2   : > { %v747_v31 = vpop.eup %746 }
 0x1d3   : > { %v749_v32 = vpop.eup %748  ;;  %395 = vperm.xlu1 %744, %v747_v31  }
 0x1d4   : > { %398 = vperm.xlu0 %745, %v749_v32  }
 0x252   : > { %v396_v33 = vpop.permute.xlu1 %395 }
 0x253   : > { %v399_v34 = vpop.permute.xlu0 %398  ;;  %v403_v35 = vrot.slane %v396_v33, %v362_v15 }
 0x254   : > { %v407_v36 = vrot.slane %v399_v34, %v362_v15 }
 0x256   : > { %v408_v37 = vsel %vm368_vm2, %v407_v36, %v403_v35 }
 0x257   : > { %v410_v38 = vsel %vm371_vm3, %v408_v37, 0.0 }
 0x258   : > { %411 = vadd.xlane.f32.xlu1 %v410_v38 }
 0x2e5   : > { %v412_v39 = vpop.xlane.xlu1 %411 }
 0x2e6   : > { %750 = vrcp.f32 %v412_v39 }
 0x2f0   : > { %v751_v40 = vpop.eup %750 }
 0x2f1   : > { %v418_v41 = vrot.slane %v751_v40, %v378_v22  ;;  %v422_v43 = vrot.slane %v751_v40, %v382_v23 }
 0x2f3   : > { %v425_v42 = vmul.f32 %v747_v31, %v418_v41  ;;  %v426_v44 = vmul.f32 %v749_v32, %v422_v43 }
 0x2f5   : > { %434 = vperm.xlu0 %745, %v425_v42  }
 0x2f9   : > { %439 = vperm.xlu0 %745, %v426_v44  }
 0x374   : > { %v435_v47 = vpop.permute.xlu0 %434 }
 0x375   : > { %v442_v48 = vmul.f32 %v655_v46, %v435_v47 }
 0x377   : > { %v444_v50 = vsel %vm349_vm1, %v442_v48, 0.0 }
 0x378   : > { %v445_v51 = vrot.slane %v444_v50, 4  ;;  %v440_v52 = vpop.permute.xlu0 %439 }
 0x379   : > { %v443_v53 = vmul.f32 %v656_v49, %v440_v52 }
 0x37a   : > { %v446_v54 = vadd.f32 %v445_v51, %v444_v50 }
 0x37b   : > { %v451_v55 = vsel %vm349_vm1, %v443_v53, 0.0 }
 0x37c   : > { %v447_v56 = vrot.slane %v446_v54, 2  ;;  %v452_v57 = vrot.slane %v451_v55, 4 }
 0x37e   : > { %v448_v58 = vadd.f32 %v447_v56, %v446_v54  ;;  %v453_v59 = vadd.f32 %v452_v57, %v451_v55 }
 0x380   : > { %v454_v60 = vrot.slane %v453_v59, 2  ;;  %v449_v61 = vrot.slane %v448_v58, 1 }
 0x382   : > { %v455_v62 = vadd.f32 %v454_v60, %v453_v59  ;;  %v450_v0 = vadd.f32 %v449_v61, %v448_v58 }
 0x384   : > { %v456_v63 = vrot.slane %v455_v62, 1 }
 0x385   : > { %468 = sbr.rel (%p636_p1) target bundleno = 1087 (0x43f), region = 60 }
 0x386   : > { %v457_v2 = vadd.f32 %v456_v63, %v455_v62 }
 0x388   : > { %v460_v3 = vsel %vm368_vm2, %v457_v2, %v450_v0 }
 0x389   : > { %v462_v4 = vadd.f32 %v460_v3, %v431_v1 }
 0x38b   : > { %464 = vst.msk [vmem:[#allocation2] sm:$0x3] %vm463_vm4, %v462_v4 }
 0x392   : > { %v470_v6 = vld [vmem:[#allocation2] sm:$0x3] }
 0x393   : > { %v471_v7 = vmul.f32 %v470_v6, %v469_v5 }
 0x395   : > { %v472_v8 = vsel %vm463_vm4, %v471_v7, 0.0 }
 0x396   : > { %473 = vadd.xlane.f32.xlu0 %v472_v8 }
 0x423   : > { %v474_v9 = vpop.xlane.xlu0 %473 }
 0x424   : > { %v637_v10 = vmul.f32 -1.442695, %v474_v9 }
 0x426   : > { %752 = vpow2.f32 %v637_v10 }
 0x430   : > { %v753_v11 = vpop.eup %752 }
 0x431   : > { %v478_v12 = vadd.f32 1.0, %v753_v11 }
 0x433   : > { %754 = vrcp.f32 %v478_v12 }
 0x43d   : > { %v755_v13 = vpop.eup %754 }
 0x43e   : > { %482 = vst.msk [vmem:[#allocation11] sm:$0x3] %vm481_vm5, %v755_v13 }
 0x43f PF: > { %p688_p4 = scmp.eq.s32.totalorder %s1097_s13, 1  ;;  %s972_s18 = smov [#allocation11]  }
 0x440   : > { %s492_s14 = sshll.u32 %s972_s18, 4  ;;  %s493_s14 = int_to_ptr.vmem [resolvable:$true] %s492_s14 }
 0x441   : > { %s874_s19 = scalar_lea.vmem %s493_s14, 32  ;;  %p881_p3 = scmp.lt.s32.totalorder %s493_s14, %s493_s14 }
 0x442   : > { %p875_p7 = scmp.ne.s32.totalorder %s493_s14, %s874_s19  ;;  %p882_p9 = scmp.lt.s32.totalorder %s874_s19, %s874_s19 }
 0x444   : > { %p876_p6 = pnand %p875_p7, %p688_p4  ;;  %p883_p5 = por %p882_p9, %p881_p3 }
 0x446   : > { %p877_p13 = pneg %p876_p6 }
 0x448   : > { %p884_p12 = pnand %p883_p5, %p877_p13 }
 0x44a   : > { %887 = shalt.err (!%p884_p12)
}
 0x44b   : > { %s888_s15 = scalar_lea.hbm %s1289_s4, 32 }
 0x44c   : > { %p889_p2 = scmp.ne.s32.totalorder %s1289_s4, %s888_s15  ;;  %p894_p10 = scmp.lt.u32.totalorder %s888_s15, %s1289_s4 }
 0x44e   : > { %p890_p11 = pnand %p889_p2, %p688_p4 }
 0x450   : > { %p891_p8 = pneg %p890_p11 }
 0x452   : > { %p896_p0 = pnand %p894_p10, %p891_p8 }
 0x454   : > { %899 = shalt.err (!%p896_p0)
}
 0x455   : > { %668 = dma.vmem_to_hbm [thread:$0]  (%p688_p4), %s493_s14, 32, %s1289_s4, [#allocation5]  }
 0x456   : > { %937 = dma.done.wait (%p688_p4), [#allocation5], 32  }
 0x457   : > { %939 = vsyncadd (%p688_p4), [#allocation5], 4294967264 }
 0x458 PF: > { %s22_s20 = sadd.s32 1, %s962_s20   ;;  %s1322_s18 = sld [smem:[#allocation16_spill]] }
 0x459   : > { %p19_p1 = scmp.ge.s32.totalorder %s22_s20, 4   ;;  %s1323_s19 = sld [smem:[#allocation17_spill]] }
 0x45a   : > { %s1324_s15 = smov %s946_s16  ;;  %s1325_s16 = smov %s950_s17 }
 0x45b   : > { %s1326_s17 = smov %s1051_s28  ;;  %21 = sbr.rel (!%p19_p1) target bundleno = 10 (0xa), region = 111 }
 0x462   :  { %505 = vsyncpa [#allocation4], 1 }
 0x463   :  { %507 = vsyncpa [#allocation4 + $0x1], 1 }
 0x464   :  { %508 = vsyncpa [#allocation7], 1 }
 0x465   :  { %510 = vsyncpa [#allocation7 + $0x1], 1 }
 0x466   :  { %511 = vsyncpa [#allocation10], 1 }
 0x467   :  { %512 = vsyncpa [#allocation5], 1 }
 0x468   :  { %514 = vsyncpa [#allocation5 + $0x1], 1 }

</bundles_post_ra>
